<compile_context>
chip_gen: v7x
topology: tpu7x:2x2x1
jax: 0.10.0
libtpu: 0.0.40
codegen_flags: <defaults>
</compile_context>

<pallas_src>
import functools

import jax
import jax.numpy as jnp
from jax.experimental import pallas as pl
from jax.experimental.pallas import tpu as pltpu

_PACK = 128        # lane width of every packed weight matrix
_BATCH_TILE = 256  # batch tile used only when batch > _BATCH_TILE


# -----------------------------------------------------------------------------
# Fused kernel: encoder + policy + MDN on packed 128-wide weights.
# -----------------------------------------------------------------------------
def _fused_kernel(x_ref, g_ref,
                  w0x_ref, w0g_ref, b_ref,
                  w1_ref, w2_ref, w3_ref,
                  out_ref):
    x = x_ref[...]
    g = g_ref[...]
    b = b_ref[...]                       # (8, 128): rows 0..3 = layer biases

    # Layer 0:  concat(x, g) @ W0  ==  x @ W0x + g @ W0g   (no JAX-side concat).
    h = (jnp.dot(x, w0x_ref[...], preferred_element_type=jnp.float32)
         + jnp.dot(g, w0g_ref[...], preferred_element_type=jnp.float32)
         + b[0:1])
    h = jnp.maximum(h, 0.0)

    # Layer 1: block-diagonal (enc | pol | mdn) hidden -> hidden.
    h = jnp.dot(h, w1_ref[...], preferred_element_type=jnp.float32) + b[1:2]
    h = jnp.maximum(h, 0.0)

    # Layer 2: MDN hidden lands in the low lanes; the encoder/policy hidden
    # activations are carried through identity blocks.  They are already
    # post-ReLU, so the full-width ReLU is a no-op on them (no select needed).
    h = jnp.dot(h, w2_ref[...], preferred_element_type=jnp.float32) + b[2:3]
    h = jnp.maximum(h, 0.0)

    # Layer 3: MDN final + encoder final + policy final, one lane-dense slab.
    out = jnp.dot(h, w3_ref[...], preferred_element_type=jnp.float32) + b[3:4]
    out_ref[...] = out.astype(out_ref.dtype)


@jax.jit
def fused_forward(x, g, packed):
    """Run the fused forward pass. Returns the lane-dense (B, 128) slab."""
    batch, isz = x.shape
    gsz = g.shape[1]
    P = packed[-1].shape[-1]

    # Single full-batch block for small batches; parallel batch grid otherwise.
    if batch <= _BATCH_TILE:
        bm, padded = batch, batch
    else:
        bm = _BATCH_TILE
        padded = pl.cdiv(batch, bm) * bm
    if padded != batch:
        x = jnp.pad(x, ((0, padded - batch), (0, 0)))
        g = jnp.pad(g, ((0, padded - batch), (0, 0)))

    flops = 2 * padded * (isz * P + gsz * P + 3 * P * P)
    bytes_accessed = 4 * (padded * (isz + gsz + P)
                          + sum(int(p.size) for p in packed))

    out = pl.pallas_call(
        _fused_kernel,
        out_shape=jax.ShapeDtypeStruct((padded, P), jnp.float32),
        grid_spec=pltpu.PrefetchScalarGridSpec(
            num_scalar_prefetch=0,
            grid=(padded // bm,),
            in_specs=[pl.BlockSpec((bm, isz), lambda i: (i, 0)),
                      pl.BlockSpec((bm, gsz), lambda i: (i, 0))]
                     + [pl.BlockSpec(p.shape, lambda i: (0, 0)) for p in packed],
            out_specs=pl.BlockSpec((bm, P), lambda i: (i, 0)),
        ),
        compiler_params=pltpu.CompilerParams(
            dimension_semantics=("parallel",)),
        cost_estimate=pl.CostEstimate(flops=flops, transcendentals=0,
                                      bytes_accessed=bytes_accessed),
    )(x, g, *packed)
    return out[:batch] if padded != batch else out


# -----------------------------------------------------------------------------
# Parameter init (PyTorch-style uniform) and reference MLP (for checking).
# -----------------------------------------------------------------------------
def init_mlp(key, dims):
    params = []
    for i in range(len(dims) - 1):
        fan_in = dims[i]
        key, k_w, k_b = jax.random.split(key, 3)
        bound = 1.0 / float(fan_in) ** 0.5
        w = jax.random.uniform(k_w, (dims[i], dims[i + 1]), jnp.float32, -bound, bound)
        b = jax.random.uniform(k_b, (1, dims[i + 1]), jnp.float32, -bound, bound)
        params.append((w, b))
    return params


def mlp_reference(x, params):
    h = x
    for i, (w, b) in enumerate(params):
        h = h @ w + b
        if i < len(params) - 1:
            h = jnp.maximum(h, 0.0)
    return h


# -----------------------------------------------------------------------------
# Model
# -----------------------------------------------------------------------------
class PallasModel:
    """JAX/Pallas port of behavioural_cloning.Model (forward pass only)."""

    def __init__(self, input_size, goal_size, action_size, N_gaussians,
                 sigma_min=0.001, key=None, hidden=32, mdn_hidden=64):
        if key is None:
            key = jax.random.PRNGKey(0)
        k_enc, k_pol, k_mdn = jax.random.split(key, 3)

        self.N_gaussians = N_gaussians
        self.sigma = 0.05              # used only by training-time NLL (not fwd)
        self.sigma_min = sigma_min
        self.input_size = input_size
        self.goal_size = goal_size
        self.a_dim = action_size[0]
        self.hidden = hidden
        self.mdn_hidden = mdn_hidden

        a_dim = self.a_dim
        # encoder = MLP(input_size, action_size[0])
        self.encoder = init_mlp(k_enc, [input_size, hidden, hidden, a_dim])
        # policy = MLPDual(input_size + goal_size, action_size)
        self.policy = init_mlp(k_pol, [input_size + goal_size, hidden, hidden, a_dim])
        # MDN = MLP(goal_size, action_size[0]*N_gaussians, hidden=64, big=True)
        self.MDN = init_mlp(k_mdn, [goal_size, mdn_hidden, mdn_hidden, mdn_hidden,
                                    a_dim * N_gaussians])

        self.packed = self._pack_params()

    def _pack_params(self):
        """Block-diagonally pack the three MLPs into 128-lane-wide matrices."""
        P = _PACK
        h, mh, a = self.hidden, self.mdn_hidden, self.a_dim
        isz, gsz = self.input_size, self.goal_size
        mdn_out = a * self.N_gaussians
        assert 2 * h + mh <= P, "hidden slab does not fit in 128 lanes"
        assert mh + 2 * h <= P, "layer-2 carry slab does not fit in 128 lanes"
        assert mdn_out + 2 * a <= P, "output slab does not fit in 128 lanes"

        (ew0, eb0), (ew1, eb1), (ew2, eb2) = self.encoder
        (pw0, pb0), (pw1, pb1), (pw2, pb2) = self.policy
        (mw0, mb0), (mw1, mb1), (mw2, mb2), (mw3, mb3) = self.MDN

        # Hidden-slab lane layout (outputs of layers 0, 1): [enc | pol | mdn | pad]
        c_enc, c_pol, c_mdn = 0, h, 2 * h

        w0x = jnp.zeros((isz, P), jnp.float32)
        w0x = w0x.at[:, c_enc:c_enc + h].set(ew0)
        w0x = w0x.at[:, c_pol:c_pol + h].set(pw0[:isz])
        w0g = jnp.zeros((gsz, P), jnp.float32)
        w0g = w0g.at[:, c_pol:c_pol + h].set(pw0[isz:])
        w0g = w0g.at[:, c_mdn:c_mdn + mh].set(mw0)

        w1 = jnp.zeros((P, P), jnp.float32)
        w1 = w1.at[c_enc:c_enc + h, c_enc:c_enc + h].set(ew1)
        w1 = w1.at[c_pol:c_pol + h, c_pol:c_pol + h].set(pw1)
        w1 = w1.at[c_mdn:c_mdn + mh, c_mdn:c_mdn + mh].set(mw1)

        # Layer-2 output layout: [mdn hidden 0:mh | enc h1 carry | pol h1 carry | pad]
        ce2, cp2 = mh, mh + h
        eye_h = jnp.eye(h, dtype=jnp.float32)
        w2 = jnp.zeros((P, P), jnp.float32)
        w2 = w2.at[c_mdn:c_mdn + mh, 0:mh].set(mw2)
        w2 = w2.at[c_enc:c_enc + h, ce2:ce2 + h].set(eye_h)   # carry enc hidden
        w2 = w2.at[c_pol:c_pol + h, cp2:cp2 + h].set(eye_h)   # carry pol hidden

        # Output-slab lane layout: [rho_flat 0:mdn_out | z | a | pad]
        zf, af = mdn_out, mdn_out + a
        w3 = jnp.zeros((P, P), jnp.float32)
        w3 = w3.at[0:mh, 0:mdn_out].set(mw3)
        w3 = w3.at[ce2:ce2 + h, zf:zf + a].set(ew2)           # encoder final layer
        w3 = w3.at[cp2:cp2 + h, af:af + a].set(pw2)           # policy final layer

        # All four biases packed in one (8, 128) slab (rows 0..3 used).
        b = jnp.zeros((8, P), jnp.float32)
        b = b.at[0, c_enc:c_enc + h].set(eb0[0])
        b = b.at[0, c_pol:c_pol + h].set(pb0[0])
        b = b.at[0, c_mdn:c_mdn + mh].set(mb0[0])
        b = b.at[1, c_enc:c_enc + h].set(eb1[0])
        b = b.at[1, c_pol:c_pol + h].set(pb1[0])
        b = b.at[1, c_mdn:c_mdn + mh].set(mb1[0])
        b = b.at[2, 0:mh].set(mb2[0])
        b = b.at[3, 0:mdn_out].set(mb3[0])
        b = b.at[3, zf:zf + a].set(eb2[0])
        b = b.at[3, af:af + a].set(pb2[0])

        self.pack_width = P
        self.z_off = zf
        self.a_off = af
        return (w0x, w0g, b, w1, w2, w3)

    def forward(self, x, g=None):
        if g is None:
            # z depends only on x (block-diagonal packing), so run the same
            # fused kernel with a zero goal and keep only z.
            g_in = jnp.zeros((x.shape[0], self.goal_size), jnp.float32)
            slab = fused_forward(x, g_in, self.packed)
            z = slab[:, self.z_off:self.z_off + self.a_dim]
            return z, None, None

        slab = fused_forward(x, g, self.packed)
        mdn_out = self.a_dim * self.N_gaussians
        rho = slab[:, :mdn_out].reshape(-1, self.N_gaussians, self.a_dim)
        z = slab[:, self.z_off:self.z_off + self.a_dim]
        a = slab[:, self.a_off:self.a_off + self.a_dim]
        return z, a, rho

    # TODO(synk): training_step_IL / training_step_equi / training_step_NLL and
    # the MixtureSameFamily NLL are training-time code paths (losses,
    # torch.distributions) and are not part of forward().


if __name__ == "__main__":
    batch = 8
    input_size = 16
    goal_size = 8
    action_size = [7]      # a[:, :3] position, a[:, 3:] rotation (quaternion)
    N_gaussians = 4

    key = jax.random.PRNGKey(0)
    k_model, k_x, k_g = jax.random.split(key, 3)

    model = PallasModel(input_size, goal_size, action_size, N_gaussians, key=k_model)

    x = jax.random.normal(k_x, (batch, input_size), jnp.float32)
    g = jax.random.normal(k_g, (batch, goal_size), jnp.float32)

    # Path with goal: (z, a, rho)
    z, a, rho = model.forward(x, g)
    jax.block_until_ready((z, a, rho))
    assert z.shape == (batch, action_size[0])
    assert a.shape == (batch, action_size[0])
    assert rho.shape == (batch, N_gaussians, action_size[0])

    # Check the fused/packed kernel against the straightforward per-MLP math.
    z_ref = mlp_reference(x, model.encoder)
    a_ref = mlp_reference(jnp.concatenate([x, g], -1), model.policy)
    rho_ref = mlp_reference(g, model.MDN).reshape(-1, N_gaussians, action_size[0])
    assert jnp.allclose(z, z_ref, atol=1e-4, rtol=1e-4)
    assert jnp.allclose(a, a_ref, atol=1e-4, rtol=1e-4)
    assert jnp.allclose(rho, rho_ref, atol=1e-4, rtol=1e-4)

    # Path without goal: (z, None, None)
    z_only, a_none, rho_none = model.forward(x)
    jax.block_until_ready(z_only)
    assert a_none is None and rho_none is None
    assert jnp.allclose(z, z_only, atol=1e-5, rtol=1e-5)

    print("KERNEL_OK")
</pallas_src>

<mosaic_0001>
module attributes {stable_mosaic.version = 11 : i64} {
  func.func @_fused_kernel(%arg0: i32, %arg1: memref<8x16xf32, #tpu.memory_space<vmem>>, %arg2: memref<8x8xf32, #tpu.memory_space<vmem>>, %arg3: memref<16x128xf32, #tpu.memory_space<vmem>>, %arg4: memref<8x128xf32, #tpu.memory_space<vmem>>, %arg5: memref<8x128xf32, #tpu.memory_space<vmem>>, %arg6: memref<128x128xf32, #tpu.memory_space<vmem>>, %arg7: memref<128x128xf32, #tpu.memory_space<vmem>>, %arg8: memref<128x128xf32, #tpu.memory_space<vmem>>, %arg9: memref<8x128xf32, #tpu.memory_space<vmem>>) attributes {dimension_semantics = [#tpu.dimension_semantics<parallel>], iteration_bounds = array<i64: 1>, scalar_prefetch = 0 : i64, scratch_operands = 0 : i64, tpu.core_type = #tpu.core_type<tc>, window_params = [{transform_indices = @transform_0, window_bounds = array<i64: 8, 16>}, {transform_indices = @transform_1, window_bounds = array<i64: 8, 8>}, {pipeline_mode = #tpu.pipeline_mode<synchronous>, transform_indices = @transform_2, window_bounds = array<i64: 16, 128>}, {pipeline_mode = #tpu.pipeline_mode<synchronous>, transform_indices = @transform_3, window_bounds = array<i64: 8, 128>}, {pipeline_mode = #tpu.pipeline_mode<synchronous>, transform_indices = @transform_4, window_bounds = array<i64: 8, 128>}, {pipeline_mode = #tpu.pipeline_mode<synchronous>, transform_indices = @transform_5, window_bounds = array<i64: 128, 128>}, {pipeline_mode = #tpu.pipeline_mode<synchronous>, transform_indices = @transform_6, window_bounds = array<i64: 128, 128>}, {pipeline_mode = #tpu.pipeline_mode<synchronous>, transform_indices = @transform_7, window_bounds = array<i64: 128, 128>}, {transform_indices = @transform_8, window_bounds = array<i64: 8, 128>}]} {
    %c0 = arith.constant 0 : index
    %c0_0 = arith.constant 0 : index
    %0 = vector.load %arg1[%c0, %c0_0] : memref<8x16xf32, #tpu.memory_space<vmem>>, vector<8x16xf32>
    %c0_1 = arith.constant 0 : index
    %c0_2 = arith.constant 0 : index
    %1 = vector.load %arg2[%c0_1, %c0_2] : memref<8x8xf32, #tpu.memory_space<vmem>>, vector<8x8xf32>
    %c0_3 = arith.constant 0 : index
    %c0_4 = arith.constant 0 : index
    %2 = vector.load %arg5[%c0_3, %c0_4] : memref<8x128xf32, #tpu.memory_space<vmem>>, vector<8x128xf32>
    %c0_5 = arith.constant 0 : index
    %c0_6 = arith.constant 0 : index
    %3 = vector.load %arg3[%c0_5, %c0_6] : memref<16x128xf32, #tpu.memory_space<vmem>>, vector<16x128xf32>
    %cst = arith.constant dense<0.000000e+00> : vector<8x128xf32>
    %4 = tpu.matmul %0, %3, %cst {dimension_numbers = #tpu.dot_dimension_numbers<[1], [0], [0], [1], [0, 0, 1, 1], [], []>} : vector<8x16xf32>, vector<16x128xf32>, vector<8x128xf32> -> vector<8x128xf32>
    %c0_7 = arith.constant 0 : index
    %c0_8 = arith.constant 0 : index
    %5 = vector.load %arg4[%c0_7, %c0_8] : memref<8x128xf32, #tpu.memory_space<vmem>>, vector<8x128xf32>
    %cst_9 = arith.constant dense<0.000000e+00> : vector<8x128xf32>
    %6 = tpu.matmul %1, %5, %cst_9 {dimension_numbers = #tpu.dot_dimension_numbers<[1], [0], [0], [1], [0, 0, 1, 1], [], []>} : vector<8x8xf32>, vector<8x128xf32>, vector<8x128xf32> -> vector<8x128xf32>
    %7 = arith.addf %4, %6 : vector<8x128xf32>
    %8 = vector.extract_strided_slice %2 {offsets = [0, 0], sizes = [1, 128], strides = [1, 1]} : vector<8x128xf32> to vector<1x128xf32>
    %9 = vector.broadcast %8 : vector<1x128xf32> to vector<8x128xf32>
    %10 = arith.addf %7, %9 : vector<8x128xf32>
    %cst_10 = arith.constant 0.000000e+00 : f32
    %11 = vector.broadcast %cst_10 : f32 to vector<8x128xf32>
    %12 = arith.maximumf %10, %11 : vector<8x128xf32>
    %c0_11 = arith.constant 0 : index
    %c0_12 = arith.constant 0 : index
    %13 = vector.load %arg6[%c0_11, %c0_12] : memref<128x128xf32, #tpu.memory_space<vmem>>, vector<128x128xf32>
    %cst_13 = arith.constant dense<0.000000e+00> : vector<8x128xf32>
    %14 = tpu.matmul %12, %13, %cst_13 {dimension_numbers = #tpu.dot_dimension_numbers<[1], [0], [0], [1], [0, 0, 1, 1], [], []>} : vector<8x128xf32>, vector<128x128xf32>, vector<8x128xf32> -> vector<8x128xf32>
    %15 = vector.extract_strided_slice %2 {offsets = [1, 0], sizes = [1, 128], strides = [1, 1]} : vector<8x128xf32> to vector<1x128xf32>
    %16 = vector.broadcast %15 : vector<1x128xf32> to vector<8x128xf32>
    %17 = arith.addf %14, %16 : vector<8x128xf32>
    %cst_14 = arith.constant 0.000000e+00 : f32
    %18 = vector.broadcast %cst_14 : f32 to vector<8x128xf32>
    %19 = arith.maximumf %17, %18 : vector<8x128xf32>
    %c0_15 = arith.constant 0 : index
    %c0_16 = arith.constant 0 : index
    %20 = vector.load %arg7[%c0_15, %c0_16] : memref<128x128xf32, #tpu.memory_space<vmem>>, vector<128x128xf32>
    %cst_17 = arith.constant dense<0.000000e+00> : vector<8x128xf32>
    %21 = tpu.matmul %19, %20, %cst_17 {dimension_numbers = #tpu.dot_dimension_numbers<[1], [0], [0], [1], [0, 0, 1, 1], [], []>} : vector<8x128xf32>, vector<128x128xf32>, vector<8x128xf32> -> vector<8x128xf32>
    %22 = vector.extract_strided_slice %2 {offsets = [2, 0], sizes = [1, 128], strides = [1, 1]} : vector<8x128xf32> to vector<1x128xf32>
    %23 = vector.broadcast %22 : vector<1x128xf32> to vector<8x128xf32>
    %24 = arith.addf %21, %23 : vector<8x128xf32>
    %cst_18 = arith.constant 0.000000e+00 : f32
    %25 = vector.broadcast %cst_18 : f32 to vector<8x128xf32>
    %26 = arith.maximumf %24, %25 : vector<8x128xf32>
    %c0_19 = arith.constant 0 : index
    %c0_20 = arith.constant 0 : index
    %27 = vector.load %arg8[%c0_19, %c0_20] : memref<128x128xf32, #tpu.memory_space<vmem>>, vector<128x128xf32>
    %cst_21 = arith.constant dense<0.000000e+00> : vector<8x128xf32>
    %28 = tpu.matmul %26, %27, %cst_21 {dimension_numbers = #tpu.dot_dimension_numbers<[1], [0], [0], [1], [0, 0, 1, 1], [], []>} : vector<8x128xf32>, vector<128x128xf32>, vector<8x128xf32> -> vector<8x128xf32>
    %29 = vector.extract_strided_slice %2 {offsets = [3, 0], sizes = [1, 128], strides = [1, 1]} : vector<8x128xf32> to vector<1x128xf32>
    %30 = vector.broadcast %29 : vector<1x128xf32> to vector<8x128xf32>
    %31 = arith.addf %28, %30 : vector<8x128xf32>
    %c0_22 = arith.constant 0 : index
    %c0_23 = arith.constant 0 : index
    %32 = vector.load %arg9[%c0_22, %c0_23] : memref<8x128xf32, #tpu.memory_space<vmem>>, vector<8x128xf32>
    tpu.vector_store %arg9[%c0_22, %c0_23], %31 {strides = array<i32>} : memref<8x128xf32, #tpu.memory_space<vmem>>, vector<8x128xf32>,
    return
  }
  func.func @transform_0(%arg0: i32) -> (i32, i32) {
    %c0_i32 = arith.constant 0 : i32
    %c0_i32_0 = arith.constant 0 : i32
    return %arg0, %c0_i32 : i32, i32
  }
  func.func @transform_1(%arg0: i32) -> (i32, i32) {
    %c0_i32 = arith.constant 0 : i32
    %c0_i32_0 = arith.constant 0 : i32
    return %arg0, %c0_i32 : i32, i32
  }
  func.func @transform_2(%arg0: i32) -> (i32, i32) {
    %c0_i32 = arith.constant 0 : i32
    %c0_i32_0 = arith.constant 0 : i32
    %c0_i32_1 = arith.constant 0 : i32
    return %c0_i32, %c0_i32_0 : i32, i32
  }
  func.func @transform_3(%arg0: i32) -> (i32, i32) {
    %c0_i32 = arith.constant 0 : i32
    %c0_i32_0 = arith.constant 0 : i32
    %c0_i32_1 = arith.constant 0 : i32
    return %c0_i32, %c0_i32_0 : i32, i32
  }
  func.func @transform_4(%arg0: i32) -> (i32, i32) {
    %c0_i32 = arith.constant 0 : i32
    %c0_i32_0 = arith.constant 0 : i32
    %c0_i32_1 = arith.constant 0 : i32
    return %c0_i32, %c0_i32_0 : i32, i32
  }
  func.func @transform_5(%arg0: i32) -> (i32, i32) {
    %c0_i32 = arith.constant 0 : i32
    %c0_i32_0 = arith.constant 0 : i32
    %c0_i32_1 = arith.constant 0 : i32
    return %c0_i32, %c0_i32_0 : i32, i32
  }
  func.func @transform_6(%arg0: i32) -> (i32, i32) {
    %c0_i32 = arith.constant 0 : i32
    %c0_i32_0 = arith.constant 0 : i32
    %c0_i32_1 = arith.constant 0 : i32
    return %c0_i32, %c0_i32_0 : i32, i32
  }
  func.func @transform_7(%arg0: i32) -> (i32, i32) {
    %c0_i32 = arith.constant 0 : i32
    %c0_i32_0 = arith.constant 0 : i32
    %c0_i32_1 = arith.constant 0 : i32
    return %c0_i32, %c0_i32_0 : i32, i32
  }
  func.func @transform_8(%arg0: i32) -> (i32, i32) {
    %c0_i32 = arith.constant 0 : i32
    %c0_i32_0 = arith.constant 0 : i32
    return %arg0, %c0_i32 : i32, i32
  }
}

</mosaic_0001>

<bundles_post_ra>
// kernel: fused_forward.1
= control target key start
LH: loop header
LB: loop body
LE: loop exit
PB: predicated region body
PF: predicated region fallthrough
CT: control target
= control target key end

     0   :  { %13 = vsyncpa [#allocation3], 0  ;;  %s1243_s0 = inlined_call_operand.hbm [shape: f32[8,16], index: 0, kind: input, shape index: {}]   ;;  %s1244_s1 = inlined_call_operand.hbm [shape: f32[8,8], index: 1, kind: input, shape index: {}]   ;;  %s1245_s2 = inlined_call_operand.hbm [shape: f32[16,128], index: 2, kind: input, shape index: {}]   ;;  %s1246_s3 = inlined_call_operand.vmem [shape: f32[8,128], index: 3, kind: input, shape index: {}]   ;;  %s1247_s4 = inlined_call_operand.hbm [shape: f32[8,128], index: 4, kind: input, shape index: {}]   ;;  %s1248_s5 = inlined_call_operand.hbm [shape: f32[128,128], index: 5, kind: input, shape index: {}]   ;;  %s1249_s6 = inlined_call_operand.hbm [shape: f32[128,128], index: 6, kind: input, shape index: {}]   ;;  %s1250_s7 = inlined_call_operand.hbm [shape: f32[128,128], index: 7, kind: input, shape index: {}]   ;;  %s1251_s8 = inlined_call_operand.hbm [shape: f32[8,128], index: 8, kind: output, shape index: {}]  }
   0x1   :  { %14 = vsyncpa [#allocation6], 0 }
   0x2   :  { %15 = vsyncpa [#allocation9], 0 }
   0x3   :  { %16 = vsyncpa [#allocation12], 0 }
   0x4   :  { %17 = vsyncpa [#allocation4], 0  ;;  %s1019_s27 = smov [#allocation5]   ;;  %s1020_s29 = smov [#allocation8]  }
   0x5   :  { %s34_s28 = sshll.u32 %s1019_s27, 4  ;;  %s58_s30 = sshll.u32 %s1020_s29, 4  ;;  %s35_s28 = int_to_ptr.vmem [resolvable:$true] %s34_s28  ;;  %s59_s30 = int_to_ptr.vmem [resolvable:$true] %s58_s30 }
   0x6   :  { %s833_s11 = scalar_lea.hbm %s1244_s1, 128 }
   0x7   :  { %p834_p0 = scmp.ne.s32.totalorder %s1244_s1, %s833_s11  ;;  %p837_p1 = scmp.lt.u32.totalorder %s833_s11, %s1244_s1 }
   0x9   :  { %p839_p2 = pnand %p837_p1, %p834_p0 }
   0xb   :  { %842 = shalt.err (!%p839_p2)
}
   0xc   :  { %s843_s16 = scalar_lea.vmem %s35_s28, 128  ;;  %p848_p4 = scmp.lt.s32.totalorder %s35_s28, %s35_s28 }
   0xd   :  { %p844_p3 = scmp.ne.s32.totalorder %s35_s28, %s843_s16  ;;  %p849_p5 = scmp.lt.s32.totalorder %s843_s16, %s843_s16 }
   0xf   :  { %p850_p6 = por %p849_p5, %p848_p4 }
  0x11   :  { %p851_p7 = pnand %p850_p6, %p844_p3 }
  0x13   :  { %854 = shalt.err (!%p851_p7)
}
  0x14   :  { %37 = dma.hbm_to_vmem [thread:$0]  %s1244_s1, 128, %s35_s28, [#allocation6]  }
  0x15   :  { %s855_s21 = scalar_lea.hbm %s1247_s4, 128 }
  0x16   :  { %p856_p8 = scmp.ne.s32.totalorder %s1247_s4, %s855_s21  ;;  %p859_p9 = scmp.lt.u32.totalorder %s855_s21, %s1247_s4 }
  0x18   :  { %p861_p10 = pnand %p859_p9, %p856_p8 }
  0x1a   :  { %864 = shalt.err (!%p861_p10)
}
  0x1b   :  { %s865_s26 = scalar_lea.vmem %s59_s30, 128  ;;  %p870_p12 = scmp.lt.s32.totalorder %s59_s30, %s59_s30 }
  0x1c   :  { %p866_p11 = scmp.ne.s32.totalorder %s59_s30, %s865_s26  ;;  %p871_p13 = scmp.lt.s32.totalorder %s865_s26, %s865_s26 }
  0x1e   :  { %p872_p0 = por %p871_p13, %p870_p12 }
  0x20   :  { %p873_p1 = pnand %p872_p0, %p866_p11 }
  0x22   :  { %876 = shalt.err (!%p873_p1)
}
  0x23   :  { %61 = dma.hbm_to_vmem [thread:$0]  %s1247_s4, 128, %s59_s30, [#allocation9]  }
  0x24   :  { %s1021_s28 = smov [#allocation11]   ;;  %s1022_s9 = smov [#allocation2]  }
  0x25   :  { %s79_s29 = sshll.u32 %s1021_s28, 4  ;;  %s24_s10 = sshll.u32 %s1022_s9, 4  ;;  %s80_s29 = int_to_ptr.vmem [resolvable:$true] %s79_s29  ;;  %s25_s10 = int_to_ptr.vmem [resolvable:$true] %s24_s10 }
  0x26   :  { %s877_s13 = scalar_lea.hbm %s1249_s6, 2048 }
  0x27   :  { %p878_p2 = scmp.ne.s32.totalorder %s1249_s6, %s877_s13  ;;  %p881_p3 = scmp.lt.u32.totalorder %s877_s13, %s1249_s6 }
  0x29   :  { %p883_p4 = pnand %p881_p3, %p878_p2 }
  0x2b   :  { %886 = shalt.err (!%p883_p4)
}
  0x2c   :  { %s887_s4 = scalar_lea.vmem %s80_s29, 2048  ;;  %p892_p6 = scmp.lt.s32.totalorder %s80_s29, %s80_s29 }
  0x2d   :  { %p888_p5 = scmp.ne.s32.totalorder %s80_s29, %s887_s4  ;;  %p893_p7 = scmp.lt.s32.totalorder %s887_s4, %s887_s4 }
  0x2f   :  { %p894_p8 = por %p893_p7, %p892_p6 }
  0x31   :  { %p895_p9 = pnand %p894_p8, %p888_p5 }
  0x33   :  { %898 = shalt.err (!%p895_p9)
}
  0x34   :  { %s1023_s30 = smov 128   ;;  %s1024_s18 = smov 8  }
  0x35   :  { %85 = dma.hbm_to_vmem [thread:$0]  %s1249_s6, 2048, %s80_s29, [#allocation12], %s1023_s30, %s1023_s30, %s1024_s18  }
  0x36   :  { %s899_s23 = scalar_lea.hbm %s1243_s0, 128 }
  0x37   :  { %p900_p10 = scmp.ne.s32.totalorder %s1243_s0, %s899_s23  ;;  %p903_p11 = scmp.lt.u32.totalorder %s899_s23, %s1243_s0 }
  0x39   :  { %p905_p12 = pnand %p903_p11, %p900_p10 }
  0x3b   :  { %908 = shalt.err (!%p905_p12)
}
  0x3c   :  { %s909_s27 = scalar_lea.vmem %s25_s10, 128  ;;  %p914_p0 = scmp.lt.s32.totalorder %s25_s10, %s25_s10 }
  0x3d   :  { %p910_p13 = scmp.ne.s32.totalorder %s25_s10, %s909_s27  ;;  %p915_p1 = scmp.lt.s32.totalorder %s909_s27, %s909_s27 }
  0x3f   :  { %p916_p2 = por %p915_p1, %p914_p0 }
  0x41   :  { %p917_p3 = pnand %p916_p2, %p910_p13 }
  0x43   :  { %920 = shalt.err (!%p917_p3)
}
  0x44   :  { %27 = dma.hbm_to_vmem [thread:$0]  %s1243_s0, 128, %s25_s10, [#allocation3]  }
  0x45   :  { %s1025_s29 = smov [#allocation7]   ;;  %s1026_s11 = smov [#allocation10]  }
  0x46   :  { %s43_s9 = sshll.u32 %s1025_s29, 4  ;;  %s67_s12 = sshll.u32 %s1026_s11, 4  ;;  %s44_s9 = int_to_ptr.vmem [resolvable:$true] %s43_s9  ;;  %s1128_s12 = int_to_ptr.vmem [resolvable:$true] %s67_s12 }
  0x47   :  { %s921_s15 = scalar_lea.hbm %s1245_s2, 256 }
  0x48   :  { %p922_p4 = scmp.ne.s32.totalorder %s1245_s2, %s921_s15  ;;  %p925_p5 = scmp.lt.u32.totalorder %s921_s15, %s1245_s2 }
  0x4a   :  { %p927_p6 = pnand %p925_p5, %p922_p4 }
  0x4c   :  { %930 = shalt.err (!%p927_p6)
}
  0x4d   :  { %s931_s0 = scalar_lea.vmem %s44_s9, 256  ;;  %p936_p8 = scmp.lt.s32.totalorder %s44_s9, %s44_s9 }
  0x4e   :  { %p932_p7 = scmp.ne.s32.totalorder %s44_s9, %s931_s0  ;;  %p937_p9 = scmp.lt.s32.totalorder %s931_s0, %s931_s0 }
  0x50   :  { %p938_p10 = por %p937_p9, %p936_p8 }
  0x52   :  { %p939_p11 = pnand %p938_p10, %p932_p7 }
  0x54   :  { %942 = shalt.err (!%p939_p11)
}
  0x55   :  { %49 = dma.hbm_to_vmem [thread:$0]  %s1245_s2, 256, %s44_s9, [#allocation6], %s1023_s30, %s1023_s30, %s1024_s18  }
  0x56   :  { %s943_s23 = scalar_lea.hbm %s1248_s5, 2048 }
  0x57   :  { %p944_p12 = scmp.ne.s32.totalorder %s1248_s5, %s943_s23  ;;  %p947_p13 = scmp.lt.u32.totalorder %s943_s23, %s1248_s5 }
  0x59   :  { %p949_p0 = pnand %p947_p13, %p944_p12 }
  0x5b   :  { %952 = shalt.err (!%p949_p0)
}
  0x5c   :  { %s953_s27 = scalar_lea.vmem %s1128_s12, 2048  ;;  %p958_p2 = scmp.lt.s32.totalorder %s1128_s12, %s1128_s12 }
  0x5d   :  { %p954_p1 = scmp.ne.s32.totalorder %s1128_s12, %s953_s27  ;;  %p959_p3 = scmp.lt.s32.totalorder %s953_s27, %s953_s27 }
  0x5f   :  { %p960_p4 = por %p959_p3, %p958_p2 }
  0x61   :  { %p961_p5 = pnand %p960_p4, %p954_p1 }
  0x63   :  { %964 = shalt.err (!%p961_p5)
}
  0x64   :  { %73 = dma.hbm_to_vmem [thread:$0]  %s1248_s5, 2048, %s1128_s12, [#allocation9], %s1023_s30, %s1023_s30, %s1024_s18  }
  0x65   :  { %s1027_s28 = smov [#allocation13]   ;;  %s965_s13 = scalar_lea.hbm %s1250_s7, 2048 }
  0x66   :  { %s91_s29 = sshll.u32 %s1027_s28, 4  ;;  %p966_p6 = scmp.ne.s32.totalorder %s1250_s7, %s965_s13  ;;  %s92_s29 = int_to_ptr.vmem [resolvable:$true] %s91_s29 }
  0x67   :  { %p969_p7 = scmp.lt.u32.totalorder %s965_s13, %s1250_s7 }
  0x69   :  { %p971_p8 = pnand %p969_p7, %p966_p6 }
  0x6b   :  { %974 = shalt.err (!%p971_p8)
}
  0x6c   :  { %s975_s4 = scalar_lea.vmem %s92_s29, 2048  ;;  %p980_p10 = scmp.lt.s32.totalorder %s92_s29, %s92_s29 }
  0x6d   :  { %p976_p9 = scmp.ne.s32.totalorder %s92_s29, %s975_s4  ;;  %p981_p11 = scmp.lt.s32.totalorder %s975_s4, %s975_s4 }
  0x6f   :  { %p982_p12 = por %p981_p11, %p980_p10 }
  0x71   :  { %p983_p13 = pnand %p982_p12, %p976_p9 }
  0x73   :  { %986 = shalt.err (!%p983_p13)
}
  0x74   :  { %97 = dma.hbm_to_vmem [thread:$0]  %s1250_s7, 2048, %s92_s29, [#allocation12], %s1023_s30, %s1023_s30, %s1024_s18  }
  0x75   :  { %1009 = dma.done.wait [#allocation3], 128  }
  0x76   :  { %1010 = vsyncadd [#allocation3], 4294967168 }
  0x77   :  { %1011 = dma.done.wait [#allocation6], 384  }
  0x78   :  { %1012 = vsyncadd [#allocation6], 4294966912 }
  0x79   :  { %1013 = dma.done.wait [#allocation9], 2176  }
  0x7a   :  { %1014 = vsyncadd [#allocation9], 4294965120 }
  0x7b   :  { %1015 = dma.done.wait [#allocation12], 4096  }
  0x7c   :  { %1016 = vsyncadd [#allocation12], 4294963200  ;;  %v1028_v0 = vmov 0.0   ;;  %vm1029_vm0 = vmmov 0   ;;  %v1030_v1 = vmov 0.0|0.0   ;;  %vm125_vm1 = vcmask 64512  }
  0x7d   :  { %628 = vmatprep.subr.mxu1 %v1028_v0  ;;  %630 = vmatprep.mubr.msk.f32.mxu1 %vm1029_vm0, %v1028_v0  ;;  %v124_v2 = vld [vmem:[%s1246_s3] sm:$0xff]  ;;  %v120_v3 = vld [vmem:[#allocation5] sm:$0xff]  ;;  %v122_v4 = vld [vmem:[#allocation7] sm:$0xff]  ;;  %vm199_vm2 = vcmask 130048   ;;  %v273_v53 = vlaneseq  ;;  %s1031_s3 = smov [#allocation14]  }
  0x7e   :  { %748 = vmatprep.subr.bf16.mxu0 %v1030_v1  ;;  %672 = vmatprep.mubr.msk.f32.mxu0 %vm1029_vm0, %v1028_v0  ;;  %v123_v5 = vld [vmem:[#allocation7 + $0x8] sm:$0xff]  ;;  %v279_v6 = vld [vmem:[#allocation10] sm:$0xff]  ;;  %v280_v8 = vld [vmem:[#allocation10 + $0x8] sm:$0xff]  ;;  %s558_s18 = sshll.u32 %s1031_s3, 4  ;;  %s559_s18 = int_to_ptr.vmem [resolvable:$true] %s558_s18 }
  0x7f   :  { %629 = vmatpush3.msra.mxu1 %v124_v2  ;;  %v746_v7 = vpack.c.bf16 %v123_v5, %v122_v4  ;;  %v281_v9 = vld [vmem:[#allocation10 + $0x10] sm:$0xff]  ;;  %v282_v10 = vld [vmem:[#allocation10 + $0x18] sm:$0xff]  ;;  %v749_v11 = vpack.c.bf16 %v280_v8, %v279_v6  ;;  %v283_v14 = vld [vmem:[#allocation10 + $0x20] sm:$0xff]  ;;  %v1210_v54 = vshrl.u32 %v273_v53, 7  ;;  %s987_s19 = scalar_lea.vmem %s559_s18, 128  ;;  %p992_p1 = scmp.lt.s32.totalorder %s559_s18, %s559_s18 }
  0x80   :  { %631 = vmatmul.mubr.msk.f32.vlgmr.msra.gmra.mrb[0].mxu1 %vm125_vm1, %v120_v3  ;;  %745 = vmatprep.subr.bf16.mxu1 %v1030_v1  ;;  %v119_v12 = vld [vmem:[#allocation2] sm:$0xff]  ;;  %v752_v13 = vpack.c.bf16 %v282_v10, %v281_v9  ;;  %v284_v15 = vld [vmem:[#allocation10 + $0x28] sm:$0xff]  ;;  %v285_v17 = vld [vmem:[#allocation10 + $0x30] sm:$0xff]  ;;  %p988_p0 = scmp.ne.s32.totalorder %s559_s18, %s987_s19  ;;  %p993_p2 = scmp.lt.s32.totalorder %s987_s19, %s987_s19 }
  0x81   :  { %637 = vmatprep.mubr.msk.f32.mxu1 %vm1029_vm0, %v1028_v0  ;;  %747 = vmatpush3.bf16.msra.mxu1 %v746_v7  ;;  %v755_v16 = vpack.c.bf16 %v284_v15, %v283_v14  ;;  %v286_v18 = vld [vmem:[#allocation10 + $0x38] sm:$0xff]  ;;  %v287_v20 = vld [vmem:[#allocation10 + $0x40] sm:$0xff]  ;;  %v288_v21 = vld [vmem:[#allocation10 + $0x48] sm:$0xff]  ;;  %v275_v56 = vsub.s32 0, %v1210_v54 }
  0x82   :  { %750 = vmatpush3.bf16.msra.mxu0 %v749_v11  ;;  %772 = vmatprep.subr.bf16.mxu1 %v1030_v1  ;;  %v758_v19 = vpack.c.bf16 %v286_v18, %v285_v17  ;;  %v761_v22 = vpack.c.bf16 %v288_v21, %v287_v20  ;;  %v289_v23 = vld [vmem:[#allocation10 + $0x50] sm:$0xff]  ;;  %v290_v24 = vld [vmem:[#allocation10 + $0x58] sm:$0xff]  ;;  %v291_v26 = vld [vmem:[#allocation10 + $0x60] sm:$0xff]  ;;  %p994_p3 = por %p993_p2, %p992_p1 }
  0x83   :  { %751 = vmatprep.subr.bf16.mxu0 %v1030_v1  ;;  %v764_v25 = vpack.c.bf16 %v290_v24, %v289_v23  ;;  %v292_v27 = vld [vmem:[#allocation10 + $0x68] sm:$0xff]  ;;  %v293_v29 = vld [vmem:[#allocation10 + $0x70] sm:$0xff]  ;;  %v294_v30 = vld [vmem:[#allocation10 + $0x78] sm:$0xff] }
  0x84   :  { %638 = vmatmul.mubr.msk.f32.vlgmr.msra.gmra.mrb[2].mxu1 %vm199_vm2, %v119_v12  ;;  %v767_v28 = vpack.c.bf16 %v292_v27, %v291_v26  ;;  %v770_v31 = vpack.c.bf16 %v294_v30, %v293_v29  ;;  %v370_v32 = vld [vmem:[#allocation11] sm:$0xff]  ;;  %v371_v33 = vld [vmem:[#allocation11 + $0x8] sm:$0xff]  ;;  %v372_v34 = vld [vmem:[#allocation11 + $0x10] sm:$0xff]  ;;  %v297_v26 = vsub.s32 1, %v1210_v54  ;;  %p995_p4 = pnand %p994_p3, %p988_p0 }
  0x85   :  { %707 = vmatprep.mubr.msk.f32.mxu1 %vm1029_vm0, %v1028_v0  ;;  %v773_v35 = vpack.c.bf16 %v371_v33, %v370_v32  ;;  %v373_v36 = vld [vmem:[#allocation11 + $0x18] sm:$0xff]  ;;  %v374_v38 = vld [vmem:[#allocation11 + $0x20] sm:$0xff]  ;;  %v375_v39 = vld [vmem:[#allocation11 + $0x28] sm:$0xff] }
  0x86   :  { %753 = vmatpush3.bf16.msra.mxu0 %v752_v13  ;;  %v776_v37 = vpack.c.bf16 %v373_v36, %v372_v34  ;;  %v779_v40 = vpack.c.bf16 %v375_v39, %v374_v38  ;;  %v376_v41 = vld [vmem:[#allocation11 + $0x30] sm:$0xff]  ;;  %v377_v42 = vld [vmem:[#allocation11 + $0x38] sm:$0xff]  ;;  %v378_v44 = vld [vmem:[#allocation11 + $0x40] sm:$0xff] }
  0x87   :  { %754 = vmatprep.subr.bf16.mxu0 %v1030_v1  ;;  %774 = vmatpush3.bf16.msra.mxu1 %v773_v35  ;;  %v782_v43 = vpack.c.bf16 %v377_v42, %v376_v41  ;;  %v379_v45 = vld [vmem:[#allocation11 + $0x48] sm:$0xff]  ;;  %v380_v47 = vld [vmem:[#allocation11 + $0x50] sm:$0xff]  ;;  %v381_v48 = vld [vmem:[#allocation11 + $0x58] sm:$0xff]  ;;  %v388_v35 = vsub.s32 2, %v1210_v54 }
  0x88   :  { %775 = vmatprep.subr.bf16.mxu1 %v1030_v1  ;;  %v785_v46 = vpack.c.bf16 %v379_v45, %v378_v44  ;;  %v788_v49 = vpack.c.bf16 %v381_v48, %v380_v47  ;;  %v382_v50 = vld [vmem:[#allocation11 + $0x60] sm:$0xff]  ;;  %v383_v51 = vld [vmem:[#allocation11 + $0x68] sm:$0xff]  ;;  %v1213_v58 = vld [vmem:[#allocation8] sm:$0xff] }
  0x89   :  { %v791_v52 = vpack.c.bf16 %v383_v51, %v382_v50  ;;  %v276_v59 = vrot.slane %v1213_v58, %v275_v56  ;;  %v384_v3 = vld [vmem:[#allocation11 + $0x70] sm:$0xff]  ;;  %v385_v4 = vld [vmem:[#allocation11 + $0x78] sm:$0xff]  ;;  %v461_v6 = vld [vmem:[#allocation13] sm:$0xff]  ;;  %v298_v27 = vrot.slane %v1213_v58, %v297_v26  ;;  %v389_v36 = vrot.slane %v1213_v58, %v388_v35 }
  0x8a   :  { %756 = vmatpush3.bf16.msra.mxu0 %v755_v16  ;;  %v794_v5 = vpack.c.bf16 %v385_v4, %v384_v3  ;;  %v462_v7 = vld [vmem:[#allocation13 + $0x8] sm:$0xff]  ;;  %v463_v8 = vld [vmem:[#allocation13 + $0x10] sm:$0xff]  ;;  %v464_v10 = vld [vmem:[#allocation13 + $0x18] sm:$0xff] }
  0x8b   :  { %757 = vmatprep.subr.bf16.mxu0 %v1030_v1  ;;  %777 = vmatpush3.bf16.msra.mxu1 %v776_v37  ;;  %v797_v9 = vpack.c.bf16 %v462_v7, %v461_v6  ;;  %v800_v11 = vpack.c.bf16 %v464_v10, %v463_v8  ;;  %v465_v12 = vld [vmem:[#allocation13 + $0x20] sm:$0xff]  ;;  %v466_v13 = vld [vmem:[#allocation13 + $0x28] sm:$0xff]  ;;  %v468_v15 = vld [vmem:[#allocation13 + $0x38] sm:$0xff] }
  0x8c   :  { %778 = vmatprep.subr.bf16.mxu1 %v1030_v1  ;;  %v803_v14 = vpack.c.bf16 %v466_v13, %v465_v12  ;;  %v469_v17 = vld [vmem:[#allocation13 + $0x40] sm:$0xff]  ;;  %v470_v18 = vld [vmem:[#allocation13 + $0x48] sm:$0xff]  ;;  %v471_v20 = vld [vmem:[#allocation13 + $0x50] sm:$0xff] }
  0x8d   :  { %v472_v21 = vld [vmem:[#allocation13 + $0x58] sm:$0xff]  ;;  %v473_v23 = vld [vmem:[#allocation13 + $0x60] sm:$0xff]  ;;  %v474_v24 = vld [vmem:[#allocation13 + $0x68] sm:$0xff] }
  0x8e   :  { %759 = vmatpush3.bf16.msra.mxu0 %v758_v19  ;;  %v809_v19 = vpack.c.bf16 %v470_v18, %v469_v17  ;;  %v475_v32 = vld [vmem:[#allocation13 + $0x70] sm:$0xff]  ;;  %v476_v33 = vld [vmem:[#allocation13 + $0x78] sm:$0xff] }
  0x8f   :  { %760 = vmatprep.subr.bf16.mxu0 %v1030_v1  ;;  %780 = vmatpush3.bf16.msra.mxu1 %v779_v40  ;;  %v818_v34 = vpack.c.bf16 %v476_v33, %v475_v32  ;;  %v479_v40 = vsub.s32 3, %v1210_v54 }
  0x90   :  { %781 = vmatprep.subr.bf16.mxu1 %v1030_v1 }
  0x91   :  { %v480_v41 = vrot.slane %v1213_v58, %v479_v40 }
  0x92   :  { %762 = vmatpush3.bf16.msra.mxu0 %v761_v22  ;;  %v812_v22 = vpack.c.bf16 %v472_v21, %v471_v20 }
  0x93   :  { %763 = vmatprep.subr.bf16.mxu0 %v1030_v1  ;;  %783 = vmatpush3.bf16.msra.mxu1 %v782_v43 }
  0x94   :  { %784 = vmatprep.subr.bf16.mxu1 %v1030_v1 }
  0x96   :  { %765 = vmatpush3.bf16.msra.mxu0 %v764_v25  ;;  %v815_v25 = vpack.c.bf16 %v474_v24, %v473_v23 }
  0x97   :  { %766 = vmatprep.subr.bf16.mxu0 %v1030_v1  ;;  %786 = vmatpush3.bf16.msra.mxu1 %v785_v46 }
  0x98   :  { %787 = vmatprep.subr.bf16.mxu1 %v1030_v1 }
  0x9a   :  { %768 = vmatpush3.bf16.msra.mxu0 %v767_v28 }
  0x9b   :  { %769 = vmatprep.subr.bf16.mxu0 %v1030_v1  ;;  %789 = vmatpush3.bf16.msra.mxu1 %v788_v49 }
  0x9c   :  { %790 = vmatprep.subr.bf16.mxu1 %v1030_v1 }
  0x9e   :  { %771 = vmatpush3.bf16.msra.mxu0 %v770_v31 }
  0x9f   :  { %796 = vmatprep.subr.bf16.mxu0 %v1030_v1  ;;  %792 = vmatpush3.bf16.msra.mxu1 %v791_v52 }
  0xa0   :  { %793 = vmatprep.subr.bf16.mxu1 %v1030_v1 }
  0xa3   :  { %795 = vmatpush3.bf16.msra.mxu1 %v794_v5 }
 0x153   :  { %v195_v55 = vpop.f32.mrb[0].mxu1 }
 0x154   :  { %v632_v57 = vpop.f32.mrb[1].mxu1 }
 0x157   :  { %v269_v60 = vpop.f32.mrb[2].mxu1 }
 0x158   :  { %v270_v61 = vadd.f32 %v269_v60, %v195_v55  ;;  %v639_v62 = vpop.f32.mrb[3].mxu1 }
 0x15a   :  { %v277_v63 = vadd.f32 %v276_v59, %v270_v61 }
 0x15c   :  { %v278_v2 = vmax.f32 %v277_v63, 0.0 }
 0x15e   :  { %673 = vmatmul.mubr.f32.vlgmr.msra.gmra.mrb[0].mxu0 %v278_v2 }
 0x15f   :  { %742 = vmatprep.mubr.msk.f32.mxu0 %vm1029_vm0, %v1028_v0  ;;  %798 = vmatpush3.bf16.msra.mxu0 %v797_v9  ;;  %v467_v0 = vld [vmem:[#allocation13 + $0x30] sm:$0xff] }
 0x160   :  { %799 = vmatprep.subr.bf16.mxu0 %v1030_v1  ;;  %v806_v16 = vpack.c.bf16 %v468_v15, %v467_v0 }
 0x163   :  { %801 = vmatpush3.bf16.msra.mxu0 %v800_v11 }
 0x164   :  { %802 = vmatprep.subr.bf16.mxu0 %v1030_v1 }
 0x167   :  { %804 = vmatpush3.bf16.msra.mxu0 %v803_v14 }
 0x168   :  { %805 = vmatprep.subr.bf16.mxu0 %v1030_v1 }
 0x16b   :  { %807 = vmatpush3.bf16.msra.mxu0 %v806_v16 }
 0x16c   :  { %808 = vmatprep.subr.bf16.mxu0 %v1030_v1 }
 0x16f   :  { %810 = vmatpush3.bf16.msra.mxu0 %v809_v19 }
 0x170   :  { %811 = vmatprep.subr.bf16.mxu0 %v1030_v1 }
 0x173   :  { %813 = vmatpush3.bf16.msra.mxu0 %v812_v22 }
 0x174   :  { %814 = vmatprep.subr.bf16.mxu0 %v1030_v1 }
 0x177   :  { %816 = vmatpush3.bf16.msra.mxu0 %v815_v25 }
 0x178   :  { %817 = vmatprep.subr.bf16.mxu0 %v1030_v1 }
 0x17b   :  { %819 = vmatpush3.bf16.msra.mxu0 %v818_v34 }
 0x231   :  { %v365_v28 = vpop.f32.mrb[0].mxu0 }
 0x232   :  { %v366_v29 = vadd.f32 %v365_v28, %v298_v27  ;;  %v674_v30 = vpop.f32.mrb[1].mxu0 }
 0x234   :  { %v369_v31 = vmax.f32 %v366_v29, 0.0 }
 0x236   :  { %708 = vmatmul.mubr.f32.vlgmr.msra.gmra.mrb[4].mxu1 %v369_v31 }
 0x309   :  { %v456_v37 = vpop.f32.mrb[4].mxu1 }
 0x30a   :  { %v457_v38 = vadd.f32 %v456_v37, %v389_v36  ;;  %v709_v1 = vpop.f32.mrb[5].mxu1 }
 0x30c   :  { %v460_v39 = vmax.f32 %v457_v38, 0.0 }
 0x30e   :  { %743 = vmatmul.mubr.f32.vlgmr.msra.gmra.mrb[2].mxu0 %v460_v39 }
 0x3e1   :  { %v547_v42 = vpop.f32.mrb[2].mxu0 }
 0x3e2   :  { %v548_v43 = vadd.f32 %v547_v42, %v480_v41  ;;  %v744_v44 = vpop.f32.mrb[3].mxu0 }
 0x3e4   :  { %551 = vst [vmem:[#allocation14] sm:$0xff] %v548_v43 }
 0x3e5   :  { %998 = shalt.err (!%p995_p4)
}
 0x3e6   :  { %s999_s20 = scalar_lea.hbm %s1251_s8, 128 }
 0x3e7   :  { %p1000_p5 = scmp.ne.s32.totalorder %s1251_s8, %s999_s20  ;;  %p1003_p6 = scmp.lt.u32.totalorder %s999_s20, %s1251_s8 }
 0x3e9   :  { %p1005_p7 = pnand %p1003_p6, %p1000_p5 }
 0x3eb   :  { %1008 = shalt.err (!%p1005_p7)
}
 0x3ec   :  { %561 = dma.vmem_to_hbm [thread:$0]  %s559_s18, 128, %s1251_s8, [#allocation4]  }
 0x3ed   :  { %1017 = dma.done.wait [#allocation4], 128  }
 0x3ee   :  { %1018 = vsyncadd [#allocation4], 4294967168 }
 0x3ef   :  { %565 = vsyncpa [#allocation3], 1 }
 0x3f0   :  { %566 = vsyncpa [#allocation6], 1 }
 0x3f1   :  { %567 = vsyncpa [#allocation9], 1 }
 0x3f2   :  { %568 = vsyncpa [#allocation12], 1 }
 0x3f3   :  { %569 = vsyncpa [#allocation4], 1 }

</bundles_post_ra>
